<compile_context>
chip_gen: v6e
topology: v6e:2x2x1
jax: 0.10.0
libtpu: 0.0.40
codegen_flags: <defaults>
</compile_context>

<pallas_src>
import functools
import math

import jax
import jax.numpy as jnp
from jax.experimental import pallas as pl
from jax.experimental.pallas import tpu as pltpu


# ---------------------------------------------------------------------------
# Kernels
# ---------------------------------------------------------------------------
def _sdpa_single_kv_kernel(q_ref, kt_ref, v_ref, o_ref, *, scale, mxu_dtype):
    """Fast path: the whole K/V sequence is a single VMEM tile (no online softmax)."""
    # q_ref: (bh, tq, Dk), kt_ref: (bh, Dk, Sk), v_ref: (bh, Sk, Dv), o_ref: (bh, tq, Dv)
    q = (q_ref[...].astype(jnp.float32) * scale).astype(mxu_dtype)
    kt = kt_ref[...].astype(mxu_dtype)
    # (bh, tq, Dk) @ (bh, Dk, Sk) -> (bh, tq, Sk); bf16 operands, f32 accumulation.
    s = jax.lax.dot_general(
        q, kt, dimension_numbers=(((2,), (1,)), ((0,), (0,))),
        preferred_element_type=jnp.float32)

    m = jnp.max(s, axis=-1, keepdims=True)
    p = jnp.exp(s - m)
    l = jnp.sum(p, axis=-1, keepdims=True)

    pv = jax.lax.dot_general(
        p.astype(mxu_dtype), v_ref[...].astype(mxu_dtype),
        dimension_numbers=(((2,), (1,)), ((0,), (0,))),
        preferred_element_type=jnp.float32)          # (bh, tq, Dv)
    o_ref[...] = (pv / l).astype(o_ref.dtype)


def _sdpa_online_kernel(q_ref, kt_ref, v_ref, o_ref,
                        q_sc, m_sc, l_sc, acc_sc, *,
                        scale, mxu_dtype, kv_len, tk, needs_mask):
    """Online-softmax path: grid = (bh_groups, q_tiles, kv_tiles), kv axis last."""
    kv = pl.program_id(2)

    @pl.when(kv == 0)
    def _init():
        # The Q block is resident across the kv axis -> hoist the *scale multiply
        # (and the cast to the MXU dtype) out of the kv loop.
        q_sc[...] = (q_ref[...].astype(jnp.float32) * scale).astype(mxu_dtype)
        m_sc[...] = jnp.full(m_sc.shape, -jnp.inf, jnp.float32)
        l_sc[...] = jnp.zeros(l_sc.shape, jnp.float32)
        acc_sc[...] = jnp.zeros(acc_sc.shape, jnp.float32)

    kt = kt_ref[...].astype(mxu_dtype)
    s = jax.lax.dot_general(
        q_sc[...], kt, dimension_numbers=(((2,), (1,)), ((0,), (0,))),
        preferred_element_type=jnp.float32)          # (bh, tq, tk)

    v = v_ref[...].astype(mxu_dtype)
    if needs_mask:
        # Last kv tile runs past Sk: mask out-of-range columns with -inf and zero the
        # corresponding (undefined) V rows so garbage cannot leak into the output.
        col = kv * tk + jax.lax.broadcasted_iota(jnp.int32, (1, 1, tk), 2)
        s = jnp.where(col < kv_len, s, -jnp.inf)
        row = kv * tk + jax.lax.broadcasted_iota(jnp.int32, (1,) + v.shape[1:], 1)
        v = jnp.where(row < kv_len, v, jnp.zeros_like(v))

    m_prev = m_sc[...]
    m_new = jnp.maximum(m_prev, jnp.max(s, axis=-1, keepdims=True))
    alpha = jnp.exp(m_prev - m_new)
    p = jnp.exp(s - m_new)

    l_sc[...] = alpha * l_sc[...] + jnp.sum(p, axis=-1, keepdims=True)
    pv = jax.lax.dot_general(
        p.astype(mxu_dtype), v,
        dimension_numbers=(((2,), (1,)), ((0,), (0,))),
        preferred_element_type=jnp.float32)
    acc_sc[...] = alpha * acc_sc[...] + pv
    m_sc[...] = m_new

    @pl.when(kv == pl.num_programs(2) - 1)
    def _finalize():
        # Exact division (off the critical path) for tight agreement with reference.
        o_ref[...] = (acc_sc[...] / l_sc[...]).astype(o_ref.dtype)


# ---------------------------------------------------------------------------
# Wrapper
# ---------------------------------------------------------------------------
def _largest_divisor_leq(n, cap):
    cap = max(1, min(cap, n))
    for t in range(cap, 0, -1):
        if n % t == 0:
            return t
    return 1


def scaled_dot_product_attention(q, k, v, *, tq_target=256, tk_target=512,
                                 bh_target=8, compute_dtype=None):
    """q: (B, H, Sq, d_k); k: (B, H, Sk, d_k); v: (B, H, Sk, d_v) -> (B, H, Sq, d_v)."""
    assert q.ndim == 4 and k.ndim == 4 and v.ndim == 4
    B, H, Sq, Dk = q.shape
    Bk, Hk, Sk, Dk2 = k.shape
    Bv, Hv, Skv, Dv = v.shape
    assert (Bk, Hk) == (B, H) and (Bv, Hv) == (B, H)
    assert Dk2 == Dk and Skv == Sk

    if compute_dtype is None:
        # bf16 MXU operands (f32 accumulation) on every TPU generation; keep the
        # native dtype if the inputs are already 16-bit floats.
        compute_dtype = (q.dtype if (jnp.issubdtype(q.dtype, jnp.floating)
                                     and q.dtype.itemsize <= 2)
                         else jnp.bfloat16)

    scale = 1.0 / math.sqrt(Dk)
    BH = B * H

    # Free reshape of leading dims; K pre-transposed so the MXU rhs is (Dk, Sk)
    # (contraction on sublanes, lane-dense tk on lanes) -> no per-step relayout.
    q3 = q.reshape(BH, Sq, Dk)
    kt3 = jnp.swapaxes(k.reshape(BH, Sk, Dk), 1, 2)     # (BH, Dk, Sk)
    v3 = v.reshape(BH, Sk, Dv)

    # Lane/sublane-aligned tiles: full extent when small, aligned targets otherwise
    # (tk is Sk or a multiple of 128; tq is Sq or a multiple of 16).
    tq_target = max(16, (tq_target // 16) * 16)
    tk_target = max(128, (tk_target // 128) * 128)
    tq = Sq if Sq <= tq_target else tq_target
    tk = Sk if Sk <= tk_target else tk_target
    q_tiles = pl.cdiv(Sq, tq)
    kv_tiles = pl.cdiv(Sk, tk)

    # Batch several (batch, head) pairs per grid step, but keep >= 2 parallel grid
    # iterations so megacore (v7x) can shard across both TensorCores.
    bh_block = _largest_divisor_leq(BH, bh_target)
    while bh_block > 1 and (BH // bh_block) * q_tiles < 2:
        bh_block = _largest_divisor_leq(BH, bh_block - 1)

    out_shape = jax.ShapeDtypeStruct((BH, Sq, Dv), q.dtype)

    if kv_tiles == 1:
        # Non-online fast path: whole K/V fits one tile per head group.
        kernel = functools.partial(_sdpa_single_kv_kernel,
                                   scale=scale, mxu_dtype=compute_dtype)
        grid = (BH // bh_block, q_tiles)
        in_specs = [
            pl.BlockSpec((bh_block, tq, Dk), lambda b, qi: (b, qi, 0)),
            pl.BlockSpec((bh_block, Dk, Sk), lambda b, qi: (b, 0, 0)),
            pl.BlockSpec((bh_block, Sk, Dv), lambda b, qi: (b, 0, 0)),
        ]
        out_specs = pl.BlockSpec((bh_block, tq, Dv), lambda b, qi: (b, qi, 0))
        scratch_shapes = []
        dim_sem = ("parallel", "parallel")
    else:
        kernel = functools.partial(
            _sdpa_online_kernel, scale=scale, mxu_dtype=compute_dtype,
            kv_len=Sk, tk=tk, needs_mask=(Sk % tk != 0))
        grid = (BH // bh_block, q_tiles, kv_tiles)
        in_specs = [
            pl.BlockSpec((bh_block, tq, Dk), lambda b, qi, ki: (b, qi, 0)),
            pl.BlockSpec((bh_block, Dk, tk), lambda b, qi, ki: (b, 0, ki)),
            pl.BlockSpec((bh_block, tk, Dv), lambda b, qi, ki: (b, ki, 0)),
        ]
        out_specs = pl.BlockSpec((bh_block, tq, Dv), lambda b, qi, ki: (b, qi, 0))
        scratch_shapes = [
            pltpu.VMEM((bh_block, tq, Dk), compute_dtype),   # pre-scaled q
            pltpu.VMEM((bh_block, tq, 1), jnp.float32),      # running max m
            pltpu.VMEM((bh_block, tq, 1), jnp.float32),      # running denom l
            pltpu.VMEM((bh_block, tq, Dv), jnp.float32),     # running numerator
        ]
        dim_sem = ("parallel", "parallel", "arbitrary")

    out = pl.pallas_call(
        kernel,
        out_shape=out_shape,
        grid_spec=pltpu.PrefetchScalarGridSpec(
            num_scalar_prefetch=0,
            grid=grid,
            in_specs=in_specs,
            out_specs=out_specs,
            scratch_shapes=scratch_shapes,
        ),
        compiler_params=pltpu.CompilerParams(
            dimension_semantics=dim_sem,
            vmem_limit_bytes=48 * 1024 * 1024,   # below v7x's 64 MiB physical VMEM
        ),
    )(q3, kt3, v3)

    return out.reshape(B, H, Sq, Dv)


# ---------------------------------------------------------------------------
# Reference + self-test
# ---------------------------------------------------------------------------
def _reference(q, k, v):
    d_k = k.shape[3]
    scores = jnp.einsum("bhqd,bhkd->bhqk", q, k) / math.sqrt(d_k)
    probs = jax.nn.softmax(scores, axis=-1)
    return jnp.einsum("bhqk,bhkd->bhqd", probs, v)


if __name__ == "__main__":
    key = jax.random.PRNGKey(0)

    # Test 1: small shapes consistent with the module (single-kv-tile fast path).
    batch, heads, seq, d_k = 2, 4, 8, 32
    kq, kk, kvv, k2 = jax.random.split(key, 4)
    Q = jax.random.normal(kq, (batch, heads, seq, d_k), dtype=jnp.float32)
    K = jax.random.normal(kk, (batch, heads, seq, d_k), dtype=jnp.float32)
    V = jax.random.normal(kvv, (batch, heads, seq, d_k), dtype=jnp.float32)

    out = jax.block_until_ready(scaled_dot_product_attention(Q, K, V))
    ref = _reference(Q, K, V)
    assert out.shape == ref.shape and out.dtype == Q.dtype
    err1 = jnp.max(jnp.abs(out - ref))
    assert err1 < 5e-2, float(err1)   # bf16 MXU operands -> looser than 1e-5

    # Test 2: longer kv sequence so the online-softmax path (multi kv tile + -inf
    # masking of the ragged tail) is exercised as well.
    kq2, kk2, kv2 = jax.random.split(k2, 3)
    Q2 = jax.random.normal(kq2, (1, 2, 16, 32), dtype=jnp.float32)
    K2 = jax.random.normal(kk2, (1, 2, 320, 32), dtype=jnp.float32)
    V2 = jax.random.normal(kv2, (1, 2, 320, 32), dtype=jnp.float32)
    out2 = jax.block_until_ready(
        scaled_dot_product_attention(Q2, K2, V2, tk_target=128))
    ref2 = _reference(Q2, K2, V2)
    err2 = jnp.max(jnp.abs(out2 - ref2))
    assert out2.shape == ref2.shape and err2 < 5e-2, float(err2)

    print("KERNEL_OK")
</pallas_src>

<mosaic_0001>
module attributes {stable_mosaic.version = 11 : i64} {
  func.func @_sdpa_single_kv_kernel(%arg0: i32, %arg1: i32, %arg2: memref<4x8x32xf32, #tpu.memory_space<vmem>>, %arg3: memref<4x32x8xf32, #tpu.memory_space<vmem>>, %arg4: memref<4x8x32xf32, #tpu.memory_space<vmem>>, %arg5: memref<4x8x32xf32, #tpu.memory_space<vmem>>) attributes {dimension_semantics = [#tpu.dimension_semantics<parallel>, #tpu.dimension_semantics<parallel>], iteration_bounds = array<i64: 2, 1>, scalar_prefetch = 0 : i64, scratch_operands = 0 : i64, tpu.core_type = #tpu.core_type<tc>, window_params = [{transform_indices = @transform_0, window_bounds = array<i64: 4, 8, 32>}, {transform_indices = @transform_1, window_bounds = array<i64: 4, 32, 8>}, {transform_indices = @transform_2, window_bounds = array<i64: 4, 8, 32>}, {transform_indices = @transform_3, window_bounds = array<i64: 4, 8, 32>}]} {
    %c0 = arith.constant 0 : index
    %c0_0 = arith.constant 0 : index
    %c0_1 = arith.constant 0 : index
    %0 = vector.load %arg2[%c0, %c0_0, %c0_1] : memref<4x8x32xf32, #tpu.memory_space<vmem>>, vector<4x8x32xf32>
    %cst = arith.constant 0.176776692 : f32
    %1 = vector.broadcast %cst : f32 to vector<4x8x32xf32>
    %2 = arith.mulf %0, %1 : vector<4x8x32xf32>
    %3 = arith.truncf %2 : vector<4x8x32xf32> to vector<4x8x32xbf16>
    %c0_2 = arith.constant 0 : index
    %c0_3 = arith.constant 0 : index
    %c0_4 = arith.constant 0 : index
    %4 = vector.load %arg3[%c0_2, %c0_3, %c0_4] : memref<4x32x8xf32, #tpu.memory_space<vmem>>, vector<4x32x8xf32>
    %5 = arith.truncf %4 : vector<4x32x8xf32> to vector<4x32x8xbf16>
    %cst_5 = arith.constant dense<0.000000e+00> : vector<4x8x8xf32>
    %6 = tpu.matmul %3, %5, %cst_5 {dimension_numbers = #tpu.dot_dimension_numbers<[2], [1], [1], [2], [0, 0, 0, 1, 1, 2], [0], [0]>} : vector<4x8x32xbf16>, vector<4x32x8xbf16>, vector<4x8x8xf32> -> vector<4x8x8xf32>
    %cst_6 = arith.constant dense<0xFF800000> : vector<4x8xf32>
    %7 = vector.multi_reduction <maximumf>, %6, %cst_6 [2] : vector<4x8x8xf32> to vector<4x8xf32>
    %8 = vector.shape_cast %7 : vector<4x8xf32> to vector<4x8x1xf32>
    %9 = vector.broadcast %8 : vector<4x8x1xf32> to vector<4x8x8xf32>
    %10 = arith.subf %6, %9 : vector<4x8x8xf32>
    %11 = math.exp %10 : vector<4x8x8xf32>
    %cst_7 = arith.constant dense<0.000000e+00> : vector<4x8xf32>
    %12 = vector.multi_reduction <add>, %11, %cst_7 [2] : vector<4x8x8xf32> to vector<4x8xf32>
    %13 = vector.shape_cast %12 : vector<4x8xf32> to vector<4x8x1xf32>
    %14 = arith.truncf %11 : vector<4x8x8xf32> to vector<4x8x8xbf16>
    %c0_8 = arith.constant 0 : index
    %c0_9 = arith.constant 0 : index
    %c0_10 = arith.constant 0 : index
    %15 = vector.load %arg4[%c0_8, %c0_9, %c0_10] : memref<4x8x32xf32, #tpu.memory_space<vmem>>, vector<4x8x32xf32>
    %16 = arith.truncf %15 : vector<4x8x32xf32> to vector<4x8x32xbf16>
    %cst_11 = arith.constant dense<0.000000e+00> : vector<4x8x32xf32>
    %17 = tpu.matmul %14, %16, %cst_11 {dimension_numbers = #tpu.dot_dimension_numbers<[2], [1], [1], [2], [0, 0, 0, 1, 1, 2], [0], [0]>} : vector<4x8x8xbf16>, vector<4x8x32xbf16>, vector<4x8x32xf32> -> vector<4x8x32xf32>
    %18 = vector.broadcast %13 : vector<4x8x1xf32> to vector<4x8x32xf32>
    %19 = arith.divf %17, %18 : vector<4x8x32xf32>
    %c0_12 = arith.constant 0 : index
    %c0_13 = arith.constant 0 : index
    %c0_14 = arith.constant 0 : index
    %20 = vector.load %arg5[%c0_12, %c0_13, %c0_14] : memref<4x8x32xf32, #tpu.memory_space<vmem>>, vector<4x8x32xf32>
    tpu.vector_store %arg5[%c0_12, %c0_13, %c0_14], %19 {strides = array<i32>} : memref<4x8x32xf32, #tpu.memory_space<vmem>>, vector<4x8x32xf32>,
    return
  }
  func.func @transform_0(%arg0: i32, %arg1: i32) -> (i32, i32, i32) {
    %c0_i32 = arith.constant 0 : i32
    %c0_i32_0 = arith.constant 0 : i32
    return %arg0, %arg1, %c0_i32 : i32, i32, i32
  }
  func.func @transform_1(%arg0: i32, %arg1: i32) -> (i32, i32, i32) {
    %c0_i32 = arith.constant 0 : i32
    %c0_i32_0 = arith.constant 0 : i32
    %c0_i32_1 = arith.constant 0 : i32
    return %arg0, %c0_i32, %c0_i32_0 : i32, i32, i32
  }
  func.func @transform_2(%arg0: i32, %arg1: i32) -> (i32, i32, i32) {
    %c0_i32 = arith.constant 0 : i32
    %c0_i32_0 = arith.constant 0 : i32
    %c0_i32_1 = arith.constant 0 : i32
    return %arg0, %c0_i32, %c0_i32_0 : i32, i32, i32
  }
  func.func @transform_3(%arg0: i32, %arg1: i32) -> (i32, i32, i32) {
    %c0_i32 = arith.constant 0 : i32
    %c0_i32_0 = arith.constant 0 : i32
    return %arg0, %arg1, %c0_i32 : i32, i32, i32
  }
}

</mosaic_0001>

<bundles_post_ra>
// kernel: tpu_custom_call.1
= control target key start
LH: loop header
LB: loop body
LE: loop exit
PB: predicated region body
PF: predicated region fallthrough
CT: control target
= control target key end

     0   :  { %8 = vsyncpa [#allocation3], 0  ;;  %s1299_s0 = inlined_call_operand.vmem [shape: f32[8,8,32], index: 0, kind: input, shape index: {}]   ;;  %s1300_s1 = inlined_call_operand.vmem [shape: f32[8,32,8], index: 1, kind: input, shape index: {}]   ;;  %s1301_s2 = inlined_call_operand.vmem [shape: f32[8,8,32], index: 2, kind: input, shape index: {}]   ;;  %s1302_s3 = inlined_call_operand.hbm [shape: f32[8,8,32], index: 3, kind: output, shape index: {}]  }
   0x1   :  { %10 = vsyncpa [#allocation3 + $0x1], 0  ;;  %s1096_s12 = smov 0   ;;  %s1098_s13 = smov 0  }
   0x2   :  { %s1100_s14 = smov 0   ;;  %s1102_s15 = smov 0  }
   0x3   :  { %s1104_s16 = smov 0   ;;  %s1106_s17 = smov 0  }
   0x4 LB: > { %s814_s18 = sadd.s32 4294967295, %s1069_s17   ;;  %s815_s19 = sadd.s32 4294967294, %s1069_s17   ;;  %s1069_s17 = sphi %s1106_s17, %s16_s17   ;;  %s1065_s16 = sphi %s1104_s16, %s1309_s16   ;;  %s1061_s15 = sphi %s1102_s15, %s1308_s15   ;;  %s1057_s14 = sphi %s1100_s14, %s1307_s14   ;;  %s1053_s13 = sphi %s1098_s13, %s1306_s13   ;;  %s1049_s12 = sphi %s1096_s12, %s1305_s12  }
   0x5   : > { %s28_s20 = sadd.s32 1, %s1065_s16  ;;  %s117_s21 = sadd.s32 1, %s1057_s14 }
   0x6   : > { %p30_p0 = scmp.ge.s32.totalorder %s28_s20, 2  ;;  %p127_p1 = scmp.ne.s32.totalorder %s1057_s14, %s1053_s13 }
   0x7   : > { %p128_p2 = scmp.eq.s32.totalorder %s814_s18, 1  ;;  %p133_p3 = scmp.ne.s32.totalorder %s1053_s13, %s1049_s12 }
   0x8   : > { %s1311_s20 = smov (%p30_p0, %s28_s20), 0  ;;  %p134_p5 = scmp.eq.s32.totalorder %s815_s19, 1 }
   0x9   : > { %p1136_p4 = por %p128_p2, %p127_p1  ;;  %s112_s23 = ssub.s32 %s1065_s16, %s1311_s20 }
   0xa   : > { %p818_p6 = scmp.ge.s32.totalorder %s1069_s17, 1  ;;  %p115_p7 = scmp.eq.s32.totalorder %s112_s23, 0 }
   0xb   : > { %p1143_p8 = por %p134_p5, %p133_p3  ;;  %p183_p9 = scmp.lt.s32.totalorder %s1069_s17, 3 }
   0xc   : > { %s1149_s25 = scalar_select %p115_p7, %s1057_s14, %s117_s21  }
   0xd   : > { %p184_p10 = pnand %p818_p6, %p183_p9 }
   0xe   : > { %s820_s26 = sshll.u32 (!%p184_p10), %s1061_s15, 2  ;;  %s218_s11 = sand.u32 (!%p184_p10), 1, %s1053_s13  }
   0xf   : > { %187 = sbr.rel (%p184_p10) target bundleno = 607 (0x25f), region = 32  ;;  %p222_p11 = scmp.lt.s32.totalorder (!%p184_p10), %s820_s26, 7 }
  0x10   : > { %s819_s18 = sshll.u32 (!%p184_p10), %s218_s11, 5  ;;  %s841_s23 = sshll.u32 (!%p184_p10), %s1061_s15, 9 }
  0x11   : > { %s220_s19 = scalar_lea.vmem (!%p184_p10), [#allocation2], %s819_s18  ;;  %s1254_s15 = scalar_lea.sflag (!%p184_p10), [#allocation3], %s218_s11 }
  0x12   : > { %s715_s21 = sshll.u32 (!%p184_p10), %s220_s19, 4  ;;  %s1073_s30 = smov (!%p184_p10), [#allocation2]   ;;  %s1244_s21 = int_to_ptr.vmem [resolvable:$true] %s715_s21 }
  0x13   : > { %s993_s29 = scalar_lea.vmem (!%p184_p10), %s1244_s21, 512 }
  0x14   : > { %v1071_v0 = vmov 0.0   ;;  %vm1072_vm0 = vmmov 0   ;;  %s1313_s26 = smov (!%p222_p11, %s820_s26), 7  ;;  %vm281_vm1 = vcmask 261120   ;;  %vm454_vm2 = vcmask 64512   ;;  %p994_p12 = scmp.ne.s32.totalorder %s1244_s21, %s993_s29 }
  0x15   : > { %862 = vmatprep.subr.bf16.mxu0 %v1071_v0  ;;  %870 = vmatprep.subr.bf16.mxu1 %v1071_v0  ;;  %s840_s27 = sshll.u32 %s1313_s26, 5  ;;  %s821_s28 = sshll.u32 %s1313_s26, 3  ;;  %vm506_vm3 = vcmask 1043456  }
  0x16   : > { %866 = vmatprep.mubr.msk.bf16.mxu0 %vm1072_vm0, %v1071_v0  ;;  %874 = vmatprep.mubr.msk.bf16.mxu1 %vm1072_vm0, %v1071_v0  ;;  %s1165_s4 = scalar_lea.vmem %s1300_s1, %s840_s27  ;;  %s1172_s7 = scalar_lea.vmem %s1299_s0, %s821_s28 }
  0x17   : > { %v259_v1 = vld [vmem:[%s1165_s4 + $0x10] sm:$0xff]  ;;  %v260_v2 = vld [vmem:[%s1165_s4 + $0x18] sm:$0xff]  ;;  %v257_v6 = vld [vmem:[%s1165_s4] sm:$0xff]  ;;  %s241_s10 = scalar_lea.vmem %s1301_s2, %s821_s28  ;;  %s1249_s28 = scalar_lea.hbm %s1302_s3, %s841_s23 }
  0x18   : > { %v263_v3 = vld [vmem:[%s1165_s4 + $0x30] sm:$0xff]  ;;  %v274_v4 = vpack.c.bf16 %v260_v2, %v259_v1  ;;  %v264_v5 = vld [vmem:[%s1165_s4 + $0x38] sm:$0xff]  ;;  %v258_v7 = vld [vmem:[%s1165_s4 + $0x8] sm:$0xff]  ;;  %p995_p13 = pnand %p994_p12, %p1136_p4 }
  0x19   : > { %v276_v8 = vpack.c.bf16 %v264_v5, %v263_v3  ;;  %v261_v9 = vld [vmem:[%s1165_s4 + $0x20] sm:$0xff]  ;;  %v262_v10 = vld [vmem:[%s1165_s4 + $0x28] sm:$0xff]  ;;  %v273_v12 = vpack.c.bf16 %v258_v7, %v257_v6  ;;  %v267_v17 = vld [vmem:[%s1165_s4 + $0x50] sm:$0xff] }
  0x1a   : > { %v245_v11 = vld [vmem:[%s1172_s7] sm:$0xff]  ;;  %863 = vmatpush3.bf16.msra.mxu0 %v274_v4  ;;  %v246_v14 = vld [vmem:[%s1172_s7 + $0x8] sm:$0xff]  ;;  %v275_v15 = vpack.c.bf16 %v262_v10, %v261_v9  ;;  %v268_v18 = vld [vmem:[%s1165_s4 + $0x58] sm:$0xff]  ;;  %p996_p0 = pneg %p995_p13 }
  0x1b   : > { %v249_v13 = vmul.f32 0.17677669, %v245_v11  ;;  %871 = vmatpush3.bf16.msra.mxu1 %v276_v8  ;;  %864 = vmatprep.subr.bf16.mxu0 %v1071_v0  ;;  %v250_v16 = vmul.f32 0.17677669, %v246_v14  ;;  %v271_v19 = vld [vmem:[%s1165_s4 + $0x70] sm:$0xff]  ;;  %v272_v20 = vld [vmem:[%s1165_s4 + $0x78] sm:$0xff]  ;;  %v278_v23 = vpack.c.bf16 %v268_v18, %v267_v17 }
  0x1c   : > { %872 = vmatprep.subr.bf16.mxu1 %v1071_v0  ;;  %v247_v24 = vld [vmem:[%s1172_s7 + $0x10] sm:$0xff]  ;;  %v280_v25 = vpack.c.bf16 %v272_v20, %v271_v19  ;;  %v265_v26 = vld [vmem:[%s1165_s4 + $0x40] sm:$0xff]  ;;  %v266_v27 = vld [vmem:[%s1165_s4 + $0x48] sm:$0xff] }
  0x1d   : > { %v253_v21 = vpack.c.bf16 %v249_v13, %v249_v13  ;;  %v254_v22 = vpack.c.bf16 %v250_v16, %v250_v16  ;;  %v248_v28 = vld [vmem:[%s1172_s7 + $0x18] sm:$0xff]  ;;  %v269_v29 = vld [vmem:[%s1165_s4 + $0x60] sm:$0xff]  ;;  %v270_v30 = vld [vmem:[%s1165_s4 + $0x68] sm:$0xff]  ;;  %v251_v31 = vmul.f32 0.17677669, %v247_v24  ;;  %v277_v32 = vpack.c.bf16 %v266_v27, %v265_v26  ;;  %s997_s4 = sshll.u32 %s1073_s30, 4  ;;  %s998_s4 = int_to_ptr.vmem [resolvable:$false] %s997_s4 }
  0x1e   : > { %865 = vmatpush3.bf16.msra.mxu0 %v273_v12  ;;  %v252_v33 = vmul.f32 0.17677669, %v248_v28  ;;  %v279_v34 = vpack.c.bf16 %v270_v30, %v269_v29  ;;  %v495_v57 = vld [vmem:[%s241_s10] sm:$0xff]  ;;  %v496_v59 = vld [vmem:[%s241_s10 + $0x8] sm:$0xff]  ;;  %v497_v63 = vld [vmem:[%s241_s10 + $0x10] sm:$0xff]  ;;  %s999_s5 = scalar_lea.vmem %s998_s4, 1024  ;;  %p1000_p1 = scmp.lt.s32.totalorder %s1244_s21, %s998_s4 }
  0x1f   : > { %873 = vmatpush3.bf16.msra.mxu1 %v275_v15  ;;  %878 = vmatprep.subr.bf16.mxu0 %v1071_v0  ;;  %v255_v35 = vpack.c.bf16 %v251_v31, %v251_v31  ;;  %v499_v58 = vpack.c.bf16 %v495_v57, %v495_v57  ;;  %v500_v61 = vpack.c.bf16 %v496_v59, %v496_v59  ;;  %v498_v2 = vld [vmem:[%s241_s10 + $0x18] sm:$0xff]  ;;  %p1001_p2 = scmp.lt.s32.totalorder %s999_s5, %s993_s29 }
  0x20   : > { %886 = vmatprep.subr.bf16.mxu1 %v1071_v0  ;;  %v256_v36 = vpack.c.bf16 %v252_v33, %v252_v33  ;;  %v501_v1 = vpack.c.bf16 %v497_v63, %v497_v63  ;;  %v502_v4 = vpack.c.bf16 %v498_v2, %v498_v2 }
  0x21   : > { %867 = vmatmul.mubr.msk.bf16.vlgmr.msra.gmra.mxu0 %vm281_vm1, %v253_v21  ;;  %v508_v60 = vsel %vm506_vm3, %v499_v58, 0  ;;  %v554_v62 = vsel %vm506_vm3, %v500_v61, 0  ;;  %p1002_p3 = por %p1001_p2, %p1000_p1 }
  0x22   : > { %875 = vmatmul.mubr.msk.bf16.vlgmr.msra.gmra.mxu1 %vm281_vm1, %v254_v22  ;;  %879 = vmatpush3.bf16.msra.mxu0 %v278_v23  ;;  %v600_v3 = vsel %vm506_vm3, %v501_v1, 0  ;;  %v646_v5 = vsel %vm506_vm3, %v502_v4, 0 }
  0x23   : > { %887 = vmatpush3.bf16.msra.mxu1 %v280_v25  ;;  %880 = vmatprep.subr.bf16.mxu0 %v1071_v0  ;;  %p1003_p5 = pnand %p1002_p3, %p996_p0 }
  0x24   : > { %888 = vmatprep.subr.bf16.mxu1 %v1071_v0  ;;  %882 = vmatprep.mubr.msk.bf16.mxu0 %vm1072_vm0, %v1071_v0 }
  0x25   : > { %890 = vmatprep.mubr.msk.bf16.mxu1 %vm1072_vm0, %v1071_v0 }
  0x26   : > { %881 = vmatpush3.bf16.msra.mxu0 %v277_v32 }
  0x27   : > { %889 = vmatpush3.bf16.msra.mxu1 %v279_v34  ;;  %894 = vmatprep.subr.bf16.mxu0 %v1071_v0 }
  0x28   : > { %900 = vmatprep.subr.bf16.mxu1 %v1071_v0 }
  0x29   : > { %883 = vmatmul.mubr.msk.bf16.vlgmr.msra.gmra.mxu0 %vm281_vm1, %v255_v35 }
  0x2a   : > { %891 = vmatmul.mubr.msk.bf16.vlgmr.msra.gmra.mxu1 %vm281_vm1, %v256_v36  ;;  %896 = vmatprep.mubr.msk.bf16.mxu0 %vm1072_vm0, %v1071_v0 }
  0x2b   : > { %902 = vmatprep.mubr.msk.bf16.mxu1 %vm1072_vm0, %v1071_v0  ;;  %895 = vmatpush3.bf16.msra.mxu0 %v508_v60 }
  0x2c   : > { %906 = vmatprep.subr.bf16.mxu0 %v1071_v0  ;;  %901 = vmatpush3.bf16.msra.mxu1 %v554_v62 }
  0x2d   : > { %912 = vmatprep.subr.bf16.mxu1 %v1071_v0 }
  0xe1   : > { %v319_v37 = vpop.f32.mrf.mxu0 }
  0xe2   : > { %v362_v38 = vpop.f32.mrf.mxu1  ;;  %v455_v39 = vsel %vm454_vm2, %v319_v37, -inf }
  0xe3   : > { %456 = vmax.xlane.f32.xlu0 %v455_v39  ;;  %v868_v40 = vpop.f32.mrf.mxu0  ;;  %v458_v42 = vsel %vm454_vm2, %v362_v38, -inf }
  0xe4   : > { %v876_v41 = vpop.f32.mrf.mxu1 }
  0xe5   : > { %v322_v43 = vpop.f32.mrf.mxu0 }
  0xe6   : > { %v365_v44 = vpop.f32.mrf.mxu1 }
  0xe7   : > { %459 = vmax.xlane.f32.xlu0 %v458_v42  ;;  %v869_v45 = vpop.f32.mrf.mxu0 }
  0xe8   : > { %v877_v46 = vpop.f32.mrf.mxu1 }
  0xe9   : > { %v405_v47 = vpop.f32.mrf.mxu0 }
  0xea   : > { %v448_v48 = vpop.f32.mrf.mxu1  ;;  %v461_v49 = vsel %vm454_vm2, %v405_v47, -inf }
  0xeb   : > { %462 = vmax.xlane.f32.xlu1 %v461_v49  ;;  %v884_v50 = vpop.f32.mrf.mxu0  ;;  %v464_v52 = vsel %vm454_vm2, %v448_v48, -inf }
  0xec   : > { %v892_v51 = vpop.f32.mrf.mxu1 }
  0xed   : > { %v408_v53 = vpop.f32.mrf.mxu0 }
  0xee   : > { %v451_v54 = vpop.f32.mrf.mxu1 }
  0xef   : > { %465 = vmax.xlane.f32.xlu1 %v464_v52  ;;  %v885_v55 = vpop.f32.mrf.mxu0 }
  0xf0   : > { %v893_v56 = vpop.f32.mrf.mxu1 }
 0x16c   : > { %v457_v6 = vpop.xlane.xlu0 %456 }
 0x16d   : > { %v467_v7 = vsub.f32 %v319_v37, %v457_v6 }
 0x16f   : > { %v471_v8 = vmul.f32 1.442695, %v467_v7 }
 0x170   : > { %v460_v9 = vpop.xlane.xlu0 %459 }
 0x171   : > { %977 = vpow2.f32 %v471_v8  ;;  %v468_v10 = vsub.f32 %v362_v38, %v460_v9 }
 0x173   : > { %v473_v11 = vmul.f32 1.442695, %v468_v10 }
 0x174   : > { %v463_v12 = vpop.xlane.xlu1 %462 }
 0x175   : > { %979 = vpow2.f32 %v473_v11  ;;  %v469_v13 = vsub.f32 %v405_v47, %v463_v12 }
 0x177   : > { %v475_v14 = vmul.f32 1.442695, %v469_v13 }
 0x178   : > { %v466_v15 = vpop.xlane.xlu1 %465 }
 0x179   : > { %981 = vpow2.f32 %v475_v14  ;;  %v470_v16 = vsub.f32 %v448_v48, %v466_v15 }
 0x17b   : > { %v477_v17 = vmul.f32 1.442695, %v470_v16 }
 0x17d   : > { %983 = vpow2.f32 %v477_v17 }
 0x17e   : > { %v978_v18 = vpop.eup %977 }
 0x17f   : > { %v479_v19 = vsel %vm454_vm2, %v978_v18, 0.0  ;;  %v491_v20 = vpack.c.bf16 %v978_v18, %v978_v18 }
 0x180   : > { %480 = vadd.xlane.f32.xlu0 %v479_v19 }
 0x181   : > { %897 = vmatmul.mubr.msk.bf16.vlgmr.msra.gmra.mxu0 %vm454_vm2, %v491_v20 }
 0x182   : > { %v980_v21 = vpop.eup %979  ;;  %907 = vmatpush3.bf16.msra.mxu0 %v600_v3  ;;  %908 = vmatprep.mubr.msk.bf16.mxu0 %vm1072_vm0, %v1071_v0 }
 0x183   : > { %v482_v22 = vsel %vm454_vm2, %v980_v21, 0.0  ;;  %v492_v23 = vpack.c.bf16 %v980_v21, %v980_v21 }
 0x184   : > { %483 = vadd.xlane.f32.xlu1 %v482_v22 }
 0x185   : > { %903 = vmatmul.mubr.msk.bf16.vlgmr.msra.gmra.mxu1 %vm454_vm2, %v492_v23 }
 0x186   : > { %v982_v24 = vpop.eup %981  ;;  %913 = vmatpush3.bf16.msra.mxu1 %v646_v5  ;;  %914 = vmatprep.mubr.msk.bf16.mxu1 %vm1072_vm0, %v1071_v0 }
 0x187   : > { %v485_v25 = vsel %vm454_vm2, %v982_v24, 0.0  ;;  %v493_v26 = vpack.c.bf16 %v982_v24, %v982_v24 }
 0x188   : > { %486 = vadd.xlane.f32.xlu0 %v485_v25 }
 0x189   : > { %909 = vmatmul.mubr.msk.bf16.vlgmr.msra.gmra.mxu0 %vm454_vm2, %v493_v26 }
 0x18a   : > { %v984_v27 = vpop.eup %983 }
 0x18b   : > { %v488_v28 = vsel %vm454_vm2, %v984_v27, 0.0  ;;  %v494_v29 = vpack.c.bf16 %v984_v27, %v984_v27 }
 0x18c   : > { %489 = vadd.xlane.f32.xlu1 %v488_v28 }
 0x18d   : > { %915 = vmatmul.mubr.msk.bf16.vlgmr.msra.gmra.mxu1 %vm454_vm2, %v494_v29 }
 0x209   : > { %v481_v30 = vpop.xlane.xlu0 %480 }
 0x20a   : > { %985 = vrcp.f32 %v481_v30 }
 0x20d   : > { %v484_v31 = vpop.xlane.xlu1 %483 }
 0x20e   : > { %987 = vrcp.f32 %v484_v31 }
 0x211   : > { %v487_v32 = vpop.xlane.xlu0 %486 }
 0x212   : > { %989 = vrcp.f32 %v487_v32 }
 0x215   : > { %v490_v0 = vpop.xlane.xlu1 %489 }
 0x216   : > { %991 = vrcp.f32 %v490_v0 }
 0x217   : > { %v986_v33 = vpop.eup %985 }
 0x21b   : > { %v988_v37 = vpop.eup %987 }
 0x21f   : > { %v990_v43 = vpop.eup %989 }
 0x223   : > { %v992_v49 = vpop.eup %991 }
 0x241   : > { %v544_v34 = vpop.f32.mrf.mxu0 }
 0x242   : > { %v689_v35 = vmul.f32 %v986_v33, %v544_v34 }
 0x243   : > { %v898_v36 = vpop.f32.mrf.mxu0 }
 0x244   : > { %696 = vst.msk [vmem:[%s220_s19] sm:$0xff] %vm281_vm1, %v689_v35 }
 0x245   : > { %v547_v38 = vpop.f32.mrf.mxu0  ;;  %v590_v39 = vpop.f32.mrf.mxu1 }
 0x246   : > { %v691_v40 = vmul.f32 %v988_v37, %v590_v39 }
 0x247   : > { %v899_v41 = vpop.f32.mrf.mxu0  ;;  %v904_v42 = vpop.f32.mrf.mxu1 }
 0x248   : > { %697 = vst.msk [vmem:[%s220_s19 + $0x8] sm:$0xff] %vm281_vm1, %v691_v40 }
 0x249   : > { %v593_v44 = vpop.f32.mrf.mxu1  ;;  %v636_v45 = vpop.f32.mrf.mxu0 }
 0x24a   : > { %v693_v46 = vmul.f32 %v990_v43, %v636_v45 }
 0x24b   : > { %v905_v47 = vpop.f32.mrf.mxu1  ;;  %v910_v48 = vpop.f32.mrf.mxu0 }
 0x24c   : > { %698 = vst.msk [vmem:[%s220_s19 + $0x10] sm:$0xff] %vm281_vm1, %v693_v46 }
 0x24d   : > { %v639_v50 = vpop.f32.mrf.mxu0  ;;  %v682_v51 = vpop.f32.mrf.mxu1 }
 0x24e   : > { %v695_v52 = vmul.f32 %v992_v49, %v682_v51 }
 0x24f   : > { %v911_v53 = vpop.f32.mrf.mxu0  ;;  %v916_v54 = vpop.f32.mrf.mxu1 }
 0x250   : > { %699 = vst.msk [vmem:[%s220_s19 + $0x18] sm:$0xff] %vm281_vm1, %v695_v52 }
 0x251   : > { %v685_v55 = vpop.f32.mrf.mxu1 }
 0x252   : > { %1006 = shalt.err (!%p1003_p5)
}
 0x253   : > { %s1007_s6 = scalar_lea.hbm %s1249_s28, 512  ;;  %s1011_s9 = scalar_lea.hbm %s1302_s3, 1024 }
 0x254   : > { %p1008_p6 = scmp.ne.s32.totalorder %s1249_s28, %s1007_s6  ;;  %p1012_p10 = scmp.lt.s32.totalorder %s1249_s28, %s1302_s3 }
 0x255   : > { %p1013_p11 = scmp.lt.s32.totalorder %s1011_s9, %s1007_s6 }
 0x256   : > { %p1009_p7 = pnand %p1008_p6, %p1136_p4 }
 0x257   : > { %p1014_p12 = por %p1013_p11, %p1012_p10 }
 0x258   : > { %p1010_p9 = pneg %p1009_p7 }
 0x25a   : > { %p1015_p13 = pnand %p1014_p12, %p1010_p9 }
 0x25c   : > { %1018 = shalt.err (!%p1015_p13)
}
 0x25d   : > { %s1074_s18 = smov 128   ;;  %s1075_s19 = smov 8   ;;  %v917_v56 = vpop.f32.mrf.mxu1 }
 0x25e   : > { %918 = dma.vmem_to_hbm [thread:$0]  (%p1136_p4), %s1244_s21, 512, %s1249_s28, %s1254_s15, %s1074_s18, %s1074_s18, %s1075_s19  }
 0x25f PF: > { %p924_p0 = scmp.ge.s32.totalorder %s1069_s17, 2  ;;  %s730_s23 = sand.u32 1, %s1049_s12  }
 0x260   : > { %s731_s26 = scalar_lea.sflag [#allocation3], %s730_s23 }
 0x261   : > { %p921_p1 = pnand %p924_p0, %p1143_p8 }
 0x263   : > { %p922_p2 = pneg %p921_p1 }
 0x265   : > { %1044 = dma.done.wait (%p922_p2), %s731_s26, 512  }
 0x266   : > { %1046 = vsyncadd (%p922_p2), %s731_s26, 4294966784  ;;  %s16_s17 = sadd.s32 1, %s1069_s17   ;;  %s1305_s12 = smov %s1053_s13 }
 0x267   : > { %p13_p3 = scmp.ge.s32.totalorder %s16_s17, 4   ;;  %s1306_s13 = smov %s1057_s14 }
 0x268   : > { %s1307_s14 = smov %s1149_s25  ;;  %s1308_s15 = smov %s1065_s16 }
 0x269   : > { %s1309_s16 = smov %s1311_s20  ;;  %15 = sbr.rel (!%p13_p3) target bundleno = 4 (0x4), region = 73 }
 0x26e   :  { %736 = vsyncpa [#allocation3], 1 }
 0x26f   :  { %738 = vsyncpa [#allocation3 + $0x1], 1 }

</bundles_post_ra>
